<compile_context>
chip_gen: v5e
topology: v5e:2x2
jax: 0.10.0
libtpu: 0.0.40
codegen_flags: <defaults>
</compile_context>

<pallas_src>
import jax
import jax.numpy as jnp
from jax.experimental import pallas as pl
from jax.experimental.pallas import tpu as pltpu


def _cls_copy_kernel(x_ref, o_ref):
    # x_ref: (TB, H) -- exactly the CLS rows (first H elements of each
    #                   flattened [S*H] batch row)
    # o_ref: (TB, H)
    o_ref[...] = x_ref[...]


def _cls_slice_kernel(x_ref, o_ref):
    # x_ref: (TB, S_TILE, H) -- minimal sublane tile containing the CLS row
    # o_ref: (TB, H)
    o_ref[...] = x_ref[:, 0, :]


def _pick_tb(B: int, row_in_bytes: int, row_out_bytes: int, sub_pack: int) -> int:
    """Pick the batch tile: big (amortize ~0.35us/step), VMEM-budgeted,
    sublane-pack aligned, and leaving >=2 grid steps when B allows (v7x)."""
    budget = 8 << 20  # double-buffered in + out blocks stay under ~8 MiB
    per_row = 2 * (row_in_bytes + row_out_bytes)
    tb = min(B, 1024, max(1, budget // max(per_row, 1)))
    if B > sub_pack:
        # keep at least 2 grid steps so both v7x TensorCores split the batch
        tb = min(tb, max(sub_pack, -(-B // 2)))
    if tb >= sub_pack:
        tb = (tb // sub_pack) * sub_pack     # sublane-dense writeback
    elif tb >= 8:
        tb = (tb // 8) * 8
    elif B >= 8:
        tb = 8
    else:
        tb = B                               # full-extent block (allowed)
    return max(1, min(tb, B))


def _compiler_params(block_bytes: int) -> pltpu.CompilerParams:
    vmem_limit = None
    if block_bytes > (12 << 20):
        # only raise the scoped limit if our (rare, huge-H) tile needs it
        vmem_limit = min(int(block_bytes * 3 // 2), 48 << 20)
    return pltpu.CompilerParams(
        dimension_semantics=("parallel",),
        vmem_limit_bytes=vmem_limit,
    )


def sequence_cls_pooler(x: jax.Array, x_mask: jax.Array | None = None) -> jax.Array:
    """Pallas equivalent of SequenceClsPooler.forward(x, x_mask) = x[..., 0, :].

    x:      [B, S, H]
    x_mask: ignored (kept for signature parity with the PyTorch module).
    returns [B, H]
    """
    del x_mask  # unused by CLS pooling, same as the PyTorch module
    B, S, H = x.shape
    itemsize = jnp.dtype(x.dtype).itemsize
    sub_pack = 8 * max(1, 4 // max(itemsize, 1))  # 8 f32, 16 bf16, 32 int8/fp8

    if H % 128 == 0 or S == 1:
        # ---- Fast path: fetch exactly the CLS row via a flat [B, S*H] view.
        xf = x.reshape(B, S * H)  # free view for contiguous row-major input
        row_bytes = H * itemsize
        tb = _pick_tb(B, row_bytes, row_bytes, sub_pack)
        grid = (pl.cdiv(B, tb),)
        block_bytes = 4 * tb * row_bytes  # 2 double-buffered blocks (in + out)
        return pl.pallas_call(
            _cls_copy_kernel,
            out_shape=jax.ShapeDtypeStruct((B, H), x.dtype),
            grid_spec=pltpu.PrefetchScalarGridSpec(
                num_scalar_prefetch=0,
                grid=grid,
                in_specs=[pl.BlockSpec((tb, H), lambda b: (b, 0))],
                out_specs=pl.BlockSpec((tb, H), lambda b: (b, 0)),
            ),
            compiler_params=_compiler_params(block_bytes),
            cost_estimate=pl.CostEstimate(
                flops=0,
                transcendentals=0,
                bytes_accessed=2 * B * H * itemsize,
            ),
        )(xf)

    # ---- Fallback path (H not a multiple of 128): minimal sublane tile.
    s_tile = S if S < sub_pack else sub_pack
    row_in_bytes = s_tile * H * itemsize
    row_out_bytes = H * itemsize
    tb = _pick_tb(B, row_in_bytes, row_out_bytes, sub_pack)
    grid = (pl.cdiv(B, tb),)
    block_bytes = 2 * tb * (row_in_bytes + row_out_bytes)
    return pl.pallas_call(
        _cls_slice_kernel,
        out_shape=jax.ShapeDtypeStruct((B, H), x.dtype),
        grid_spec=pltpu.PrefetchScalarGridSpec(
            num_scalar_prefetch=0,
            grid=grid,
            in_specs=[pl.BlockSpec((tb, s_tile, H), lambda b: (b, 0, 0))],
            out_specs=pl.BlockSpec((tb, H), lambda b: (b, 0)),
        ),
        compiler_params=_compiler_params(block_bytes),
        cost_estimate=pl.CostEstimate(
            flops=0,
            transcendentals=0,
            bytes_accessed=B * s_tile * H * itemsize + B * H * itemsize,
        ),
    )(x)


if __name__ == "__main__":
    key = jax.random.PRNGKey(0)

    # Fast path: H is a multiple of 128.
    B, S, H = 16, 8, 128
    kx, km, kx2 = jax.random.split(key, 3)
    x = jax.random.normal(kx, (B, S, H), dtype=jnp.float32)
    x_mask = (jax.random.uniform(km, (B, S, 1)) > 0.2).astype(jnp.int32)

    out = sequence_cls_pooler(x, x_mask)
    out = jax.block_until_ready(out)
    ref = x[:, 0, :]
    assert out.shape == (B, H)
    assert jnp.array_equal(out, ref), "Pallas CLS pooling (fast path) mismatch"

    # Fallback path: H not lane-aligned.
    B2, S2, H2 = 6, 8, 64
    x2 = jax.random.normal(kx2, (B2, S2, H2), dtype=jnp.float32)
    out2 = jax.block_until_ready(sequence_cls_pooler(x2, None))
    assert out2.shape == (B2, H2)
    assert jnp.array_equal(out2, x2[:, 0, :]), "Pallas CLS pooling (fallback) mismatch"

    print("KERNEL_OK")
</pallas_src>

<mosaic_0001>
module attributes {stable_mosaic.version = 11 : i64} {
  func.func @_cls_copy_kernel(%arg0: i32, %arg1: memref<8x128xf32, #tpu.memory_space<vmem>>, %arg2: memref<8x128xf32, #tpu.memory_space<vmem>>) attributes {dimension_semantics = [#tpu.dimension_semantics<parallel>], iteration_bounds = array<i64: 2>, scalar_prefetch = 0 : i64, scratch_operands = 0 : i64, tpu.core_type = #tpu.core_type<tc>, window_params = [{transform_indices = @transform_0, window_bounds = array<i64: 8, 128>}, {transform_indices = @transform_1, window_bounds = array<i64: 8, 128>}]} {
    %c0 = arith.constant 0 : index
    %c0_0 = arith.constant 0 : index
    %0 = vector.load %arg1[%c0, %c0_0] : memref<8x128xf32, #tpu.memory_space<vmem>>, vector<8x128xf32>
    %c0_1 = arith.constant 0 : index
    %c0_2 = arith.constant 0 : index
    %1 = vector.load %arg2[%c0_1, %c0_2] : memref<8x128xf32, #tpu.memory_space<vmem>>, vector<8x128xf32>
    tpu.vector_store %arg2[%c0_1, %c0_2], %0 {strides = array<i32>} : memref<8x128xf32, #tpu.memory_space<vmem>>, vector<8x128xf32>,
    return
  }
  func.func @transform_0(%arg0: i32) -> (i32, i32) {
    %c0_i32 = arith.constant 0 : i32
    %c0_i32_0 = arith.constant 0 : i32
    return %arg0, %c0_i32 : i32, i32
  }
  func.func @transform_1(%arg0: i32) -> (i32, i32) {
    %c0_i32 = arith.constant 0 : i32
    %c0_i32_0 = arith.constant 0 : i32
    return %arg0, %c0_i32 : i32, i32
  }
}

</mosaic_0001>

<bundles_post_ra>
// kernel: tpu_custom_call.1
= control target key start
LH: loop header
LB: loop body
LE: loop exit
PB: predicated region body
PF: predicated region fallthrough
CT: control target
= control target key end

     0   :  { %6 = vsyncpa [#allocation3], 0  ;;  %s518_s0 = inlined_call_operand.hbm [shape: f32[16,1024], index: 0, kind: input, shape index: {}]   ;;  %s519_s1 = inlined_call_operand.hbm [shape: f32[16,128], index: 1, kind: output, shape index: {}]  }
   0x1   :  { %8 = vsyncpa [#allocation3 + $0x1], 0 }
   0x2   :  { %9 = vsyncpa [#allocation4], 0 }
   0x3   :  { %11 = vsyncpa [#allocation4 + $0x1], 0  ;;  %s391_s6 = smov 0   ;;  %s393_s7 = smov 0  }
   0x4   :  { %s395_s8 = smov 0   ;;  %s397_s9 = smov 0  }
   0x5 LB: > { %s412_s10 = sadd.s32 4294967295, %s379_s9   ;;  %s223_s11 = sadd.s32 4294967294, %s379_s9   ;;  %s379_s9 = sphi %s397_s9, %s529_s9   ;;  %s375_s8 = sphi %s395_s8, %s528_s8   ;;  %s371_s7 = sphi %s393_s7, %s527_s7   ;;  %s367_s6 = sphi %s391_s6, %s526_s6  }
   0x6   : > { %s416_s12 = sadd.s32 1, %s379_s9   ;;  %s24_s13 = sadd.s32 1, %s375_s8 }
   0x7   : > { %s21_s14 = ssub.s32 %s379_s9, %s416_s12  ;;  %p31_p0 = scmp.ne.s32.totalorder %s375_s8, %s371_s7 }
   0x8   : > { %p22_p1 = scmp.eq.s32.totalorder %s21_s14, 0  ;;  %p32_p2 = scmp.eq.s32.totalorder %s379_s9, 0 }
   0x9   : > { %p37_p3 = scmp.ne.s32.totalorder %s371_s7, %s367_s6  ;;  %p38_p4 = scmp.eq.s32.totalorder %s412_s10, 0 }
   0xa   : > { %s428_s15 = scalar_select %p22_p1, %s375_s8, %s24_s13  }
   0xb   : > { %p430_p5 = por %p32_p2, %p31_p0  ;;  %p434_p6 = por %p38_p4, %p37_p3 }
   0xc   : > { %p61_p7 = scmp.eq.s32.totalorder %s412_s10, 1  ;;  %p67_p8 = scmp.eq.s32.totalorder %s223_s11, 1 }
   0xd   : > { %p249_p10 = scmp.lt.s32.totalorder %s379_s9, 2  ;;  %s87_s20 = sand.u32 1, %s375_s8  }
   0xe   : > { %p441_p11 = por %p61_p7, %p31_p0  ;;  %p445_p12 = por %p67_p8, %p37_p3 }
   0xf   : > { %s236_s21 = sshll.u32 %s379_s9, 6  ;;  %s226_s22 = sshll.u32 %s87_s20, 3 }
  0x10   : > { %s96_s25 = scalar_lea.hbm %s518_s0, %s236_s21  ;;  %s91_s27 = scalar_lea.vmem [#allocation2], %s226_s22 }
  0x11   : > { %s98_s26 = sshll.u32 %s96_s25, 4  ;;  %s100_s28 = sshll.u32 %s91_s27, 4  ;;  %s99_s26 = int_to_ptr.hbm [resolvable:$true] %s98_s26  ;;  %s101_s28 = int_to_ptr.vmem [resolvable:$true] %s100_s28 }
  0x12   : > { %p456_p13 = pnand %p249_p10, %p430_p5  ;;  %p229_p0 = scmp.ge.s32.totalorder %s379_s9, 1 }
  0x13   : > { %p105_p1 = scmp.lt.s32.totalorder %s379_s9, 3  ;;  %s88_s30 = scalar_lea.sflag [#allocation3], %s87_s20 }
  0x14   : > { %s283_s2 = sshra.s32 %s99_s26, 4  ;;  %p287_p3 = pneg %p456_p13  ;;  %s284_s2 = int_to_ptr.hbm [resolvable:$true] %s283_s2 }
  0x15   : > { %s285_s3 = scalar_lea.hbm %s284_s2, 8  ;;  %s290_s11 = scalar_lea.hbm %s518_s0, 128 }
  0x16   : > { %p286_p2 = scmp.ne.s32.totalorder %s284_s2, %s285_s3  ;;  %p291_p5 = scmp.lt.s32.totalorder %s284_s2, %s518_s0 }
  0x17   : > { %p292_p8 = scmp.lt.s32.totalorder %s290_s11, %s285_s3 }
  0x18   : > { %p288_p4 = pnand %p287_p3, %p286_p2 }
  0x19   : > { %p293_p10 = por %p292_p8, %p291_p5 }
  0x1a   : > { %p289_p7 = pneg %p288_p4 }
  0x1c   : > { %p294_p9 = pnand %p293_p10, %p289_p7 }
  0x1e   : > { %297 = shalt.err (!%p294_p9)
}
  0x1f   : > { %244 = dma.hbm_to_vmem [thread:$0]  (!%p456_p13), %s99_s26, 128, %s101_s28, %s88_s30  }
  0x20   : > { %p106_p2 = pnand %p229_p0, %p105_p1 }
  0x21   : > { %s477_s16 = sand.u32 (!%p106_p2), 1, %s371_s7  }
  0x22   : > { %109 = sbr.rel (%p106_p2) target bundleno = 55 (0x37), region = 24  ;;  %s230_s20 = sshll.u32 (!%p106_p2), %s477_s16, 3 }
  0x23   : > { %s112_s21 = scalar_lea.sflag (!%p106_p2), [#allocation3], %s477_s16  ;;  %s115_s22 = scalar_lea.vmem (!%p106_p2), [#allocation2], %s230_s20 }
  0x27   : > { %358 = dma.done.wait (%p434_p6), %s112_s21, 128  }
  0x28   : > { %360 = vsyncadd (%p434_p6), %s112_s21, 4294967168  ;;  %s233_s23 = sshll.u32 %s412_s10, 3  ;;  %s134_s27 = scalar_lea.vmem [#allocation5], %s230_s20  ;;  %v135_v0 = vld [vmem:[%s115_s22] sm:$0xff] }
  0x29   : > { %s148_s26 = scalar_lea.hbm %s519_s1, %s233_s23  ;;  %s150_s28 = sshll.u32 %s134_s27, 4  ;;  %136 = vst [vmem:[%s134_s27] sm:$0xff] %v135_v0  ;;  %s151_s28 = int_to_ptr.vmem [resolvable:$true] %s150_s28 }
  0x2a   : > { %s152_s29 = sshll.u32 %s148_s26, 4  ;;  %s138_s30 = scalar_lea.sflag [#allocation4], %s477_s16  ;;  %s153_s29 = int_to_ptr.hbm [resolvable:$true] %s152_s29 }
  0x2b   : > { %s327_s2 = sshra.s32 %s153_s29, 4  ;;  %s333_s4 = scalar_lea.hbm %s519_s1, 16  ;;  %s328_s2 = int_to_ptr.hbm [resolvable:$true] %s327_s2 }
  0x2c   : > { %s329_s17 = scalar_lea.hbm %s328_s2, 8  ;;  %p334_p0 = scmp.lt.s32.totalorder %s328_s2, %s519_s1 }
  0x2d   : > { %p330_p6 = scmp.ne.s32.totalorder %s328_s2, %s329_s17  ;;  %p335_p1 = scmp.lt.s32.totalorder %s333_s4, %s329_s17 }
  0x2f   : > { %p331_p9 = pnand %p330_p6, %p441_p11  ;;  %p336_p3 = por %p335_p1, %p334_p0 }
  0x31   : > { %p332_p13 = pneg %p331_p9 }
  0x33   : > { %p337_p4 = pnand %p336_p3, %p332_p13 }
  0x35   : > { %340 = shalt.err (!%p337_p4)
}
  0x36   : > { %239 = dma.vmem_to_hbm [thread:$0]  (%p441_p11), %s151_s28, 128, %s153_s29, %s138_s30  }
  0x37 PF: > { %s164_s13 = sand.u32 1, %s367_s6   ;;  %p525_p7 = scmp.ge.s32.totalorder %s379_s9, 2 }
  0x38   : > { %s165_s14 = scalar_lea.sflag [#allocation4], %s164_s13 }
  0x39   : > { %p246_p5 = pnand %p525_p7, %p445_p12 }
  0x3b   : > { %p247_p8 = pneg %p246_p5 }
  0x3d   : > { %362 = dma.done.wait (%p247_p8), %s165_s14, 128  }
  0x3e   : > { %364 = vsyncadd (%p247_p8), %s165_s14, 4294967168  ;;  %p14_p10 = scmp.ge.s32.totalorder %s416_s12, 4   ;;  %s526_s6 = smov %s371_s7 }
  0x3f   : > { %s527_s7 = smov %s375_s8  ;;  %s528_s8 = smov %s428_s15 }
  0x40   : > { %s529_s9 = smov %s416_s12  ;;  %16 = sbr.rel (!%p14_p10) target bundleno = 5 (0x5), region = 69 }
  0x45   :  { %171 = vsyncpa [#allocation3], 1 }
  0x46   :  { %173 = vsyncpa [#allocation3 + $0x1], 1 }
  0x47   :  { %174 = vsyncpa [#allocation4], 1 }
  0x48   :  { %176 = vsyncpa [#allocation4 + $0x1], 1 }

</bundles_post_ra>
